<compile_context>
chip_gen: v7x
topology: tpu7x:2x2x1
jax: 0.10.0
libtpu: 0.0.40
codegen_flags: <defaults>
</compile_context>

<pallas_src>
import functools
import math

import jax
import jax.numpy as jnp
from jax import lax
from jax.experimental import pallas as pl
from jax.experimental.pallas import tpu as pltpu


_NB_MAX = 8  # batch elements per grid step: nb*Q >= 128 -> lane-dense output stores


def _batch_blocking(n):
    """Pick (n_blocks, nb, n_pad): >=2 blocks whenever N>=2 (v7x megacore), nb <= _NB_MAX."""
    n_blocks = max(min(n, 2), -(-n // _NB_MAX))
    nb = -(-n // n_blocks)
    return n_blocks, nb, n_blocks * nb


def _attn_kernel(ctx_ref, q_proj_ref, wo_mix_ref, out_qt_ref, out_ref, mix_ref):
    """Attention core for one block of nb batch elements.

    Ref shapes (per grid step):
      ctx_ref    : (1, D_in, nb*L)    packed context slab (batch packed along lanes)
      q_proj_ref : (Q, D_in)          linear_in(query)           (batch-invariant, precomputed)
      wo_mix_ref : (D_out, D_in)      linear_out.weight[:, :D_in]
      out_qt_ref : (D_out, nb*Q)      (linear_out.weight[:, D_in:] @ q_proj^T) tiled nb times
      out_ref    : (1, D_out, nb*Q)   tanh(linear_out([mix, q_proj]))^T, batch packed along lanes
      mix_ref    : (D_in, nb*Q)       VMEM scratch holding the packed mix^T
    """
    q_proj = q_proj_ref[...]                                  # (Q, D_in)
    ctx = ctx_ref[0]                                          # (D_in, nb*L)
    q_n = q_proj.shape[0]
    nb = out_ref.shape[2] // q_n
    l_n = ctx.shape[1] // nb

    # One MXU push for all nb scores matrices: (Q, D_in) @ (D_in, nb*L).
    scores_all = jnp.dot(q_proj, ctx, preferred_element_type=jnp.float32)   # (Q, nb*L)

    # Per-element softmax + mix^T (nb <= 8, statically unrolled; results land in VMEM scratch,
    # so nothing stays live across iterations).
    for b in range(nb):
        sc = scores_all[:, b * l_n:(b + 1) * l_n]             # (Q, L)
        sc = sc - jnp.max(sc, axis=-1, keepdims=True)
        e = jnp.exp(sc)
        w = e / jnp.sum(e, axis=-1, keepdims=True)            # exact divide (review fix)
        ctx_b = ctx[:, b * l_n:(b + 1) * l_n]                 # (D_in, L)
        # mix^T = ctx_b @ w^T  (contract the L axes; no in-kernel transpose)
        mix_ref[:, b * q_n:(b + 1) * q_n] = lax.dot_general(
            ctx_b, w, dimension_numbers=(((1,), (1,)), ((), ())),
            preferred_element_type=jnp.float32)               # (D_in, Q)

    # Batched epilogue: ONE projection matmul, one add, one tanh, one lane-dense store.
    out_t = jnp.dot(wo_mix_ref[...], mix_ref[...],
                    preferred_element_type=jnp.float32) + out_qt_ref[...]   # (D_out, nb*Q)
    out_ref[0] = jnp.tanh(out_t).astype(out_ref.dtype)


def attn_layer_pallas(query_param, context_ndl, w_in, w_out):
    """AttnLayer attention core via Pallas.

    Args:
      query_param : (Q, D_in)        learned query
      context_ndl : (N, D_in, L)     context in its NATIVE AttnBlock layout
      w_in        : (D_in, D_in)     linear_in.weight  (PyTorch [out, in])
      w_out       : (D_out, 2*D_in)  linear_out.weight (PyTorch [out, in])
    Returns:
      attn_out_t  : (N, D_out, Q)    == transpose(attn_out, (0, 2, 1))  (AttnLayer layout)
    """
    N, D_in, L = context_ndl.shape
    Q = query_param.shape[0]
    D_out = w_out.shape[0]

    n_blocks, nb, n_pad = _batch_blocking(N)

    # --- batch-invariant work hoisted out of the kernel (tiny, done once) ---
    q_proj = jnp.dot(query_param, w_in.T)                     # (Q, D_in)   = linear_in(query)
    wo_mix = w_out[:, :D_in]                                  # (D_out, D_in)
    out_q_t = jnp.dot(w_out[:, D_in:], q_proj.T)              # (D_out, Q)  = (q_proj @ Wo_q^T)^T
    out_qt_tiled = jnp.tile(out_q_t, (1, nb))                 # (D_out, nb*Q)

    # --- pack context into a lane-dense slab: (n_blocks, D_in, nb*L), pad the batch tail ---
    ctx = context_ndl
    if n_pad != N:
        ctx = jnp.pad(ctx, ((0, n_pad - N), (0, 0), (0, 0)))
    ctx_slab = (ctx.reshape(n_blocks, nb, D_in, L)
                   .transpose(0, 2, 1, 3)
                   .reshape(n_blocks, D_in, nb * L))

    grid_spec = pltpu.PrefetchScalarGridSpec(
        num_scalar_prefetch=0,
        grid=(n_blocks,),
        in_specs=[
            pl.BlockSpec((1, D_in, nb * L), lambda i: (i, 0, 0)),
            pl.BlockSpec((Q, D_in), lambda i: (0, 0)),
            pl.BlockSpec((D_out, D_in), lambda i: (0, 0)),
            pl.BlockSpec((D_out, nb * Q), lambda i: (0, 0)),
        ],
        out_specs=pl.BlockSpec((1, D_out, nb * Q), lambda i: (i, 0, 0)),
        scratch_shapes=[pltpu.VMEM((D_in, nb * Q), jnp.float32)],
    )

    out_packed = pl.pallas_call(
        _attn_kernel,
        out_shape=jax.ShapeDtypeStruct((n_blocks, D_out, nb * Q), jnp.float32),
        grid_spec=grid_spec,
        compiler_params=pltpu.CompilerParams(
            dimension_semantics=("parallel",)),
    )(ctx_slab, q_proj, wo_mix, out_qt_tiled)

    # Un-pack (n_blocks, D_out, nb*Q) -> (N, D_out, Q)  (tiny wrapper transpose).
    attn_t = (out_packed.reshape(n_blocks, D_out, nb, Q)
                        .transpose(0, 2, 1, 3)
                        .reshape(n_pad, D_out, Q))[:N]
    return attn_t


def _upsample_concat_kernel(cat_ref, attn_ref, gmat_ref, out_ref):
    """Fused nearest-upsample + channel concat for one batch element.

    Ref shapes:
      cat_ref  : (1, C, H*W)
      attn_ref : (1, D_out, Q)
      gmat_ref : (Q, H*W)        constant 0/1 nearest-neighbour gather matrix
      out_ref  : (1, C + D_out, H*W)
    """
    c = cat_ref.shape[1]
    out_ref[0, :c, :] = cat_ref[0]
    up = jnp.dot(attn_ref[0], gmat_ref[...],
                 preferred_element_type=jnp.float32)          # (D_out, H*W), lane-dense
    out_ref[0, c:, :] = up.astype(out_ref.dtype)


def upsample_concat_pallas(cat_tensor, attn_t, hq, wq):
    """F.interpolate(attn_map, (H, W), mode='nearest') + torch.cat([cat_tensor, attn_map], 1)."""
    N, C, H, W = cat_tensor.shape
    D_out, Q = attn_t.shape[1], attn_t.shape[2]
    HW = H * W

    # Gather matrix: G[q, h*W + w] = 1 iff q == src(h, w), src = floor(dst * in/out)
    # (matches PyTorch nearest interpolation).  Upsample becomes one MXU matmul.
    row_src = (jnp.arange(H) * hq) // H                       # (H,)
    col_src = (jnp.arange(W) * wq) // W                       # (W,)
    src = row_src[:, None] * wq + col_src[None, :]            # (H, W) in [0, Q)
    gmat = (jnp.arange(Q)[:, None, None] == src[None]).astype(jnp.float32).reshape(Q, HW)

    cat_flat = cat_tensor.reshape(N, C, HW)

    grid_spec = pltpu.PrefetchScalarGridSpec(
        num_scalar_prefetch=0,
        grid=(N,),
        in_specs=[
            pl.BlockSpec((1, C, HW), lambda n: (n, 0, 0)),
            pl.BlockSpec((1, D_out, Q), lambda n: (n, 0, 0)),
            pl.BlockSpec((Q, HW), lambda n: (0, 0)),
        ],
        out_specs=pl.BlockSpec((1, C + D_out, HW), lambda n: (n, 0, 0)),
    )
    out_flat = pl.pallas_call(
        _upsample_concat_kernel,
        out_shape=jax.ShapeDtypeStruct((N, C + D_out, HW), cat_tensor.dtype),
        grid_spec=grid_spec,
        compiler_params=pltpu.CompilerParams(
            dimension_semantics=("parallel",)),
    )(cat_flat, attn_t.astype(jnp.float32), gmat)
    return out_flat.reshape(N, C + D_out, H, W)


def attn_block_forward(params, cat_tensor, context):
    """AttnBlock.forward: cat_tensor (N,C,H,W), context (N,D_in,L) -> (N, C+D_out, H, W)."""
    attn_t = attn_layer_pallas(params["query"], context,
                               params["w_in"], params["w_out"])   # (N, D_out, Q)
    Q = attn_t.shape[2]
    hq = wq = int(round(math.sqrt(Q)))
    assert hq * wq == Q, "attn_num_query must be a perfect square"
    # TODO(synk): the remaining cat_tensor read+write would vanish entirely only if the
    # upstream producer wrote directly into the first C channels of a donated output buffer.
    return upsample_concat_pallas(cat_tensor, attn_t, hq, wq)


def attn_block_reference(params, cat_tensor, context):
    """Pure-JAX reference matching the PyTorch module (sanity check)."""
    N, C, H, W = cat_tensor.shape
    ctx_nld = jnp.transpose(context, (0, 2, 1))                    # (N, L, D_in)
    q = jnp.broadcast_to(params["query"][None], (N,) + params["query"].shape)
    q_proj = jnp.einsum("nqd,ed->nqe", q, params["w_in"])          # linear_in
    scores = jnp.einsum("nqd,nld->nql", q_proj, ctx_nld)
    weights = jax.nn.softmax(scores, axis=-1)
    mix = jnp.einsum("nql,nld->nqd", weights, ctx_nld)
    combined = jnp.concatenate([mix, q_proj], axis=-1)
    out = jnp.tanh(jnp.einsum("nqc,oc->nqo", combined, params["w_out"]))
    D_out = out.shape[-1]
    Q = out.shape[1]
    hq = wq = int(round(math.sqrt(Q)))
    attn_map = jnp.transpose(out, (0, 2, 1)).reshape(N, D_out, hq, wq)
    row_idx = (jnp.arange(H) * hq) // H
    col_idx = (jnp.arange(W) * wq) // W
    attn_map = attn_map[:, :, row_idx, :][:, :, :, col_idx]
    return jnp.concatenate([cat_tensor, attn_map.astype(cat_tensor.dtype)], axis=1)


def init_params(key, attn_dim_in, attn_dim_out, attn_num_query):
    k1, k2, k3 = jax.random.split(key, 3)
    query = jax.random.normal(k1, (attn_num_query, attn_dim_in), jnp.float32)
    b_in = 1.0 / math.sqrt(attn_dim_in)
    w_in = jax.random.uniform(k2, (attn_dim_in, attn_dim_in), jnp.float32, -b_in, b_in)
    b_out = 1.0 / math.sqrt(2 * attn_dim_in)
    w_out = jax.random.uniform(k3, (attn_dim_out, 2 * attn_dim_in), jnp.float32, -b_out, b_out)
    return {"query": query, "w_in": w_in, "w_out": w_out}


if __name__ == "__main__":
    D_in, L = 32, 8
    D_out, NUM_Q = 8, 16

    key = jax.random.PRNGKey(0)
    k_par, k_rest = jax.random.split(key)
    params = init_params(k_par, D_in, D_out, NUM_Q)

    fwd = jax.jit(functools.partial(attn_block_forward, params))
    ref = functools.partial(attn_block_reference, params)

    # Case 1: small default shapes.  Case 2: N not divisible by the batch block
    # (exercises the padded tail + multi-element block path).
    for (N, C, H, W) in [(2, 4, 16, 16), (11, 4, 16, 16)]:
        k1, k2, k_rest = jax.random.split(k_rest, 3)
        cat_tensor = jax.random.normal(k1, (N, C, H, W), jnp.float32)
        context = jax.random.normal(k2, (N, D_in, L), jnp.float32)

        out = fwd(cat_tensor, context)
        jax.block_until_ready(out)

        assert out.shape == (N, C + D_out, H, W), out.shape
        assert bool(jnp.all(jnp.isfinite(out)))
        err = float(jnp.max(jnp.abs(out - ref(cat_tensor, context))))
        assert err < 1e-3, err

    print("KERNEL_OK")
</pallas_src>

<mosaic_0001>
module attributes {stable_mosaic.version = 11 : i64} {
  func.func @_attn_kernel(%arg0: i32, %arg1: memref<1x32x8xf32, #tpu.memory_space<vmem>>, %arg2: memref<16x32xf32, #tpu.memory_space<vmem>>, %arg3: memref<8x32xf32, #tpu.memory_space<vmem>>, %arg4: memref<8x16xf32, #tpu.memory_space<vmem>>, %arg5: memref<1x8x16xf32, #tpu.memory_space<vmem>>, %arg6: memref<32x16xf32, #tpu.memory_space<vmem>>) attributes {dimension_semantics = [#tpu.dimension_semantics<parallel>], iteration_bounds = array<i64: 2>, scalar_prefetch = 0 : i64, scratch_operands = 1 : i64, tpu.core_type = #tpu.core_type<tc>, window_params = [{transform_indices = @transform_0, window_bounds = array<i64: 1, 32, 8>}, {pipeline_mode = #tpu.pipeline_mode<synchronous>, transform_indices = @transform_1, window_bounds = array<i64: 16, 32>}, {pipeline_mode = #tpu.pipeline_mode<synchronous>, transform_indices = @transform_2, window_bounds = array<i64: 8, 32>}, {pipeline_mode = #tpu.pipeline_mode<synchronous>, transform_indices = @transform_3, window_bounds = array<i64: 8, 16>}, {transform_indices = @transform_4, window_bounds = array<i64: 1, 8, 16>}]} {
    %c0 = arith.constant 0 : index
    %c0_0 = arith.constant 0 : index
    %0 = vector.load %arg2[%c0, %c0_0] : memref<16x32xf32, #tpu.memory_space<vmem>>, vector<16x32xf32>
    %c0_1 = arith.constant 0 : index
    %c0_2 = arith.constant 0 : index
    %c0_3 = arith.constant 0 : index
    %1 = vector.load %arg1[%c0_1, %c0_2, %c0_3] : memref<1x32x8xf32, #tpu.memory_space<vmem>>, vector<1x32x8xf32>
    %2 = vector.shape_cast %1 : vector<1x32x8xf32> to vector<32x8xf32>
    %cst = arith.constant dense<0.000000e+00> : vector<16x8xf32>
    %3 = tpu.matmul %0, %2, %cst {dimension_numbers = #tpu.dot_dimension_numbers<[1], [0], [0], [1], [0, 0, 1, 1], [], []>} : vector<16x32xf32>, vector<32x8xf32>, vector<16x8xf32> -> vector<16x8xf32>
    %cst_4 = arith.constant dense<0xFF800000> : vector<16xf32>
    %4 = vector.multi_reduction <maximumf>, %3, %cst_4 [1] : vector<16x8xf32> to vector<16xf32>
    %5 = vector.shape_cast %4 : vector<16xf32> to vector<16x1xf32>
    %6 = vector.broadcast %5 : vector<16x1xf32> to vector<16x8xf32>
    %7 = arith.subf %3, %6 : vector<16x8xf32>
    %8 = math.exp %7 : vector<16x8xf32>
    %cst_5 = arith.constant dense<0.000000e+00> : vector<16xf32>
    %9 = vector.multi_reduction <add>, %8, %cst_5 [1] : vector<16x8xf32> to vector<16xf32>
    %10 = vector.shape_cast %9 : vector<16xf32> to vector<16x1xf32>
    %11 = vector.broadcast %10 : vector<16x1xf32> to vector<16x8xf32>
    %12 = arith.divf %8, %11 : vector<16x8xf32>
    %cst_6 = arith.constant dense<0.000000e+00> : vector<32x16xf32>
    %13 = tpu.matmul %2, %12, %cst_6 {dimension_numbers = #tpu.dot_dimension_numbers<[1], [1], [0], [0], [0, 0, 1, 0], [], []>} : vector<32x8xf32>, vector<16x8xf32>, vector<32x16xf32> -> vector<32x16xf32>
    %c0_7 = arith.constant 0 : index
    %c0_8 = arith.constant 0 : index
    %14 = vector.load %arg6[%c0_7, %c0_8] : memref<32x16xf32, #tpu.memory_space<vmem>>, vector<32x16xf32>
    tpu.vector_store %arg6[%c0_7, %c0_8], %13 {strides = array<i32>} : memref<32x16xf32, #tpu.memory_space<vmem>>, vector<32x16xf32>,
    %c0_9 = arith.constant 0 : index
    %c0_10 = arith.constant 0 : index
    %15 = vector.load %arg3[%c0_9, %c0_10] : memref<8x32xf32, #tpu.memory_space<vmem>>, vector<8x32xf32>
    %c0_11 = arith.constant 0 : index
    %c0_12 = arith.constant 0 : index
    %16 = vector.load %arg6[%c0_11, %c0_12] : memref<32x16xf32, #tpu.memory_space<vmem>>, vector<32x16xf32>
    %cst_13 = arith.constant dense<0.000000e+00> : vector<8x16xf32>
    %17 = tpu.matmul %15, %16, %cst_13 {dimension_numbers = #tpu.dot_dimension_numbers<[1], [0], [0], [1], [0, 0, 1, 1], [], []>} : vector<8x32xf32>, vector<32x16xf32>, vector<8x16xf32> -> vector<8x16xf32>
    %c0_14 = arith.constant 0 : index
    %c0_15 = arith.constant 0 : index
    %18 = vector.load %arg4[%c0_14, %c0_15] : memref<8x16xf32, #tpu.memory_space<vmem>>, vector<8x16xf32>
    %19 = arith.addf %17, %18 : vector<8x16xf32>
    %20 = math.tanh %19 : vector<8x16xf32>
    %c0_16 = arith.constant 0 : index
    %c0_17 = arith.constant 0 : index
    %c0_18 = arith.constant 0 : index
    %21 = vector.load %arg5[%c0_16, %c0_17, %c0_18] : memref<1x8x16xf32, #tpu.memory_space<vmem>>, vector<1x8x16xf32>
    %22 = vector.shape_cast %21 : vector<1x8x16xf32> to vector<8x16xf32>
    %23 = vector.shape_cast %20 : vector<8x16xf32> to vector<1x8x16xf32>
    tpu.vector_store %arg5[%c0_16, %c0_17, %c0_18], %23 {strides = array<i32>} : memref<1x8x16xf32, #tpu.memory_space<vmem>>, vector<1x8x16xf32>,
    return
  }
  func.func @transform_0(%arg0: i32) -> (i32, i32, i32) {
    %c0_i32 = arith.constant 0 : i32
    %c0_i32_0 = arith.constant 0 : i32
    %c0_i32_1 = arith.constant 0 : i32
    return %arg0, %c0_i32, %c0_i32_0 : i32, i32, i32
  }
  func.func @transform_1(%arg0: i32) -> (i32, i32) {
    %c0_i32 = arith.constant 0 : i32
    %c0_i32_0 = arith.constant 0 : i32
    %c0_i32_1 = arith.constant 0 : i32
    return %c0_i32, %c0_i32_0 : i32, i32
  }
  func.func @transform_2(%arg0: i32) -> (i32, i32) {
    %c0_i32 = arith.constant 0 : i32
    %c0_i32_0 = arith.constant 0 : i32
    %c0_i32_1 = arith.constant 0 : i32
    return %c0_i32, %c0_i32_0 : i32, i32
  }
  func.func @transform_3(%arg0: i32) -> (i32, i32) {
    %c0_i32 = arith.constant 0 : i32
    %c0_i32_0 = arith.constant 0 : i32
    %c0_i32_1 = arith.constant 0 : i32
    return %c0_i32, %c0_i32_0 : i32, i32
  }
  func.func @transform_4(%arg0: i32) -> (i32, i32, i32) {
    %c0_i32 = arith.constant 0 : i32
    %c0_i32_0 = arith.constant 0 : i32
    %c0_i32_1 = arith.constant 0 : i32
    return %arg0, %c0_i32, %c0_i32_0 : i32, i32, i32
  }
}

module attributes {stable_mosaic.version = 11 : i64} {
  func.func @_upsample_concat_kernel(%arg0: i32, %arg1: memref<1x4x256xf32, #tpu.memory_space<vmem>>, %arg2: memref<1x8x16xf32, #tpu.memory_space<vmem>>, %arg3: memref<16x256xf32, #tpu.memory_space<vmem>>, %arg4: memref<1x12x256xf32, #tpu.memory_space<vmem>>) attributes {dimension_semantics = [#tpu.dimension_semantics<parallel>], iteration_bounds = array<i64: 2>, scalar_prefetch = 0 : i64, scratch_operands = 0 : i64, tpu.core_type = #tpu.core_type<tc>, window_params = [{transform_indices = @transform_0, window_bounds = array<i64: 1, 4, 256>}, {transform_indices = @transform_1, window_bounds = array<i64: 1, 8, 16>}, {pipeline_mode = #tpu.pipeline_mode<synchronous>, transform_indices = @transform_2, window_bounds = array<i64: 16, 256>}, {transform_indices = @transform_3, window_bounds = array<i64: 1, 12, 256>}]} {
    %c0 = arith.constant 0 : index
    %c0_0 = arith.constant 0 : index
    %c0_1 = arith.constant 0 : index
    %0 = vector.load %arg1[%c0, %c0_0, %c0_1] : memref<1x4x256xf32, #tpu.memory_space<vmem>>, vector<1x4x256xf32>
    %1 = vector.shape_cast %0 : vector<1x4x256xf32> to vector<4x256xf32>
    %c0_2 = arith.constant 0 : index
    %c0_3 = arith.constant 0 : index
    %c0_4 = arith.constant 0 : index
    %2 = vector.load %arg4[%c0_2, %c0_3, %c0_4] : memref<1x12x256xf32, #tpu.memory_space<vmem>>, vector<1x4x256xf32>
    %3 = vector.shape_cast %2 : vector<1x4x256xf32> to vector<4x256xf32>
    %4 = vector.shape_cast %1 : vector<4x256xf32> to vector<1x4x256xf32>
    tpu.vector_store %arg4[%c0_2, %c0_3, %c0_4], %4 {strides = array<i32>} : memref<1x12x256xf32, #tpu.memory_space<vmem>>, vector<1x4x256xf32>,
    %c0_5 = arith.constant 0 : index
    %c0_6 = arith.constant 0 : index
    %c0_7 = arith.constant 0 : index
    %5 = vector.load %arg2[%c0_5, %c0_6, %c0_7] : memref<1x8x16xf32, #tpu.memory_space<vmem>>, vector<1x8x16xf32>
    %6 = vector.shape_cast %5 : vector<1x8x16xf32> to vector<8x16xf32>
    %c0_8 = arith.constant 0 : index
    %c0_9 = arith.constant 0 : index
    %7 = vector.load %arg3[%c0_8, %c0_9] : memref<16x256xf32, #tpu.memory_space<vmem>>, vector<16x256xf32>
    %cst = arith.constant dense<0.000000e+00> : vector<8x256xf32>
    %8 = tpu.matmul %6, %7, %cst {dimension_numbers = #tpu.dot_dimension_numbers<[1], [0], [0], [1], [0, 0, 1, 1], [], []>} : vector<8x16xf32>, vector<16x256xf32>, vector<8x256xf32> -> vector<8x256xf32>
    %c0_10 = arith.constant 0 : index
    %c4 = arith.constant 4 : index
    %c0_11 = arith.constant 0 : index
    %9 = vector.load %arg4[%c0_10, %c4, %c0_11] : memref<1x12x256xf32, #tpu.memory_space<vmem>>, vector<1x8x256xf32>
    %10 = vector.shape_cast %9 : vector<1x8x256xf32> to vector<8x256xf32>
    %11 = vector.shape_cast %8 : vector<8x256xf32> to vector<1x8x256xf32>
    tpu.vector_store %arg4[%c0_10, %c4, %c0_11], %11 {strides = array<i32>} : memref<1x12x256xf32, #tpu.memory_space<vmem>>, vector<1x8x256xf32>,
    return
  }
  func.func @transform_0(%arg0: i32) -> (i32, i32, i32) {
    %c0_i32 = arith.constant 0 : i32
    %c0_i32_0 = arith.constant 0 : i32
    %c0_i32_1 = arith.constant 0 : i32
    return %arg0, %c0_i32, %c0_i32_0 : i32, i32, i32
  }
  func.func @transform_1(%arg0: i32) -> (i32, i32, i32) {
    %c0_i32 = arith.constant 0 : i32
    %c0_i32_0 = arith.constant 0 : i32
    %c0_i32_1 = arith.constant 0 : i32
    return %arg0, %c0_i32, %c0_i32_0 : i32, i32, i32
  }
  func.func @transform_2(%arg0: i32) -> (i32, i32) {
    %c0_i32 = arith.constant 0 : i32
    %c0_i32_0 = arith.constant 0 : i32
    %c0_i32_1 = arith.constant 0 : i32
    return %c0_i32, %c0_i32_0 : i32, i32
  }
  func.func @transform_3(%arg0: i32) -> (i32, i32, i32) {
    %c0_i32 = arith.constant 0 : i32
    %c0_i32_0 = arith.constant 0 : i32
    %c0_i32_1 = arith.constant 0 : i32
    return %arg0, %c0_i32, %c0_i32_0 : i32, i32, i32
  }
}

</mosaic_0001>

<bundles_post_ra>
// kernel: attn_block_forward.3
= control target key start
LH: loop header
LB: loop body
LE: loop exit
PB: predicated region body
PF: predicated region fallthrough
CT: control target
= control target key end

     0   :  { %s409_s12 = smov 0   ;;  %s441_s0 = inlined_call_operand.vmem [shape: f32[2,4,256], index: 0, kind: input, shape index: {}]   ;;  %s442_s1 = inlined_call_operand.vmem [shape: f32[2,8,16], index: 1, kind: input, shape index: {}]   ;;  %s443_s2 = inlined_call_operand.vmem [shape: f32[16,256], index: 2, kind: input, shape index: {}]   ;;  %s444_s3 = inlined_call_operand.vmem [shape: f32[2,12,256], index: 3, kind: output, shape index: {}]  }
   0x1 LB: > { %s351_s13 = sadd.s32 4294967295, %s386_s12   ;;  %p355_p0 = scmp.ge.s32.totalorder %s386_s12, 1  ;;  %s386_s12 = sphi %s409_s12, %s13_s12  }
   0x2   : > { %p146_p1 = scmp.lt.s32.totalorder %s386_s12, 3 }
   0x4   : > { %p147_p2 = pnand %p355_p0, %p146_p1 }
   0x5   : > { %v196_v0 = vld [vmem:[%s443_s2 + $0x8] sm:$0xff] (!%p147_p2)  ;;  %v198_v1 = vld [vmem:[%s443_s2 + $0x18] sm:$0xff] (!%p147_p2)  ;;  %v195_v2 = vld [vmem:[%s443_s2] sm:$0xff] (!%p147_p2)  ;;  %p174_p3 = scmp.lt.s32.totalorder (!%p147_p2), %s351_s13, 1  ;;  %v388_v5 = vmov (!%p147_p2), 0.0   ;;  %vm199_vm0 = vcmask (!%p147_p2), 130048  }
   0x6   : > { %150 = sbr.rel (%p147_p2) target bundleno = 234 (0xea), region = 32  ;;  %v366_v3 = vpack.c.bf16 (!%p147_p2), %v198_v1, %v196_v0  ;;  %v197_v4 = vld [vmem:[%s443_s2 + $0x10] sm:$0xff] (!%p147_p2)  ;;  %267 = vmatprep.mubr.f32.mxu0 (!%p147_p2), %v388_v5 }
   0x7   : > { %v368_v6 = vpack.c.bf16 (!%p147_p2), %v197_v4, %v195_v2 }
   0x8   : > { %367 = vmatprep.subr.bf16.mxu0 (!%p147_p2), %v366_v3 }
   0x9   : > { %369 = vmatpush1.bf16.msra.mxu0 (!%p147_p2), %v368_v6 }
   0xd   : > { %s446_s13 = smov (!%p174_p3, %s351_s13), 1 }
   0xe   : > { %s364_s22 = sshll.u32 %s446_s13, 3  ;;  %s365_s23 = sshll.u32 %s446_s13, 5 }
   0xf   : > { %s178_s26 = scalar_lea.vmem %s441_s0, %s364_s22  ;;  %s182_s29 = scalar_lea.vmem %s442_s1, %s364_s22 }
  0x10   : > { %s187_s5 = scalar_lea.vmem %s444_s3, %s365_s23  ;;  %v188_v7 = vld [vmem:[%s178_s26] sm:$0xff] }
  0x11   : > { %v194_v8 = vld [vmem:[%s182_s29] sm:$0xff]  ;;  %v190_v9 = vcombine.high %v188_v7, %v188_v7  ;;  %192 = vst [vmem:[%s187_s5] sm:$0xf] %v188_v7 }
  0x12   : > { %361 = vmatmul.mubr.msk.f32.vlgmr.msra.gmra.mrb[0].mxu0 %vm199_vm0, %v194_v8 }
  0x13   : > { %193 = vst [vmem:[%s187_s5 + $0x8] sm:$0xf] %v190_v9 }
  0xe5   : > { %v269_v10 = vpop.f32.mrb[0].mxu0 }
  0xe6   : > { %v276_v11 = vrot.slane %v269_v10, 4  ;;  %v271_v12 = vpop.f32.mrb[1].mxu0 }
  0xe7   : > { %v277_v13 = vrot.slane %v271_v12, 4 }
  0xe8   : > { %280 = vst [vmem:[%s187_s5 + $0x10] ss:$-12 sps:$4 sm:$0xff] %v276_v11  }
  0xe9   : > { %281 = vst [vmem:[%s187_s5 + $0x18] ss:$-12 sps:$4 sm:$0xff] %v277_v13  }
  0xea PF: > { %s13_s12 = sadd.s32 1, %s386_s12  }
  0xeb   : > { %p10_p4 = scmp.ge.s32.totalorder %s13_s12, 4  }
  0xed   :  { %12 = sbr.rel (!%p10_p4) target bundleno = 1 (0x1), region = 65 }

// kernel: attn_block_forward.2
= control target key start
LH: loop header
LB: loop body
LE: loop exit
PB: predicated region body
PF: predicated region fallthrough
CT: control target
= control target key end

     0   :  { %s695_s15 = smov 0   ;;  %s746_s0 = inlined_call_operand.vmem [shape: f32[2,32,8], index: 0, kind: input, shape index: {}]   ;;  %s747_s1 = inlined_call_operand.vmem [shape: f32[16,32], index: 1, kind: input, shape index: {}]   ;;  %s748_s2 = inlined_call_operand.vmem [shape: f32[8,32], index: 2, kind: input, shape index: {}]   ;;  %s749_s3 = inlined_call_operand.vmem [shape: f32[8,16], index: 3, kind: input, shape index: {}]   ;;  %s750_s4 = inlined_call_operand.vmem [shape: f32[2,8,16], index: 4, kind: output, shape index: {}]  }
   0x1 LB: > { %s549_s16 = sadd.s32 4294967295, %s665_s15   ;;  %p553_p0 = scmp.ge.s32.totalorder %s665_s15, 1  ;;  %s665_s15 = sphi %s695_s15, %s14_s15  }
   0x2   : > { %p162_p1 = scmp.lt.s32.totalorder %s665_s15, 3 }
   0x4   : > { %p163_p2 = pnand %p553_p0, %p162_p1 }
   0x5   : > { %p187_p3 = scmp.lt.s32.totalorder (!%p163_p2), %s549_s16, 1  ;;  %v196_v0 = vld [vmem:[%s747_s1] sm:$0xff] (!%p163_p2)  ;;  %vm202_vm0 = vcmask (!%p163_p2), 261120   ;;  %v197_v7 = vld [vmem:[%s747_s1 + $0x8] sm:$0xff] (!%p163_p2)  ;;  %vm284_vm1 = vcmask (!%p163_p2), 64512   ;;  %v667_v29 = vmov (!%p163_p2), 0.0|0.0  }
   0x6   : > { %166 = sbr.rel (%p163_p2) target bundleno = 1024 (0x400), region = 36  ;;  %594 = vmatprep.mubr.msk.f32.mxu0 (!%p163_p2), %vm202_vm0, %v196_v0  ;;  %vm627_vm2 = vmpackc.low (!%p163_p2), %vm284_vm1, %vm284_vm1  ;;  %vm668_vm3 = vmmov (!%p163_p2), 0   ;;  %v669_v30 = vmov (!%p163_p2), 0.0   ;;  %vm410_vm4 = vcmask (!%p163_p2), 130048   ;;  %v415_v41 = vld [vmem:[%s748_s2] sm:$0xff] (!%p163_p2) }
   0x7   : > { %v420_v42 = vld [vmem:[%s749_s3] sm:$0xff] (!%p163_p2) }
   0xd   : > { %s752_s16 = smov (!%p187_p3, %s549_s16), 1 }
   0xe   : > { %s568_s19 = sshll.u32 %s752_s16, 5  ;;  %s556_s29 = sshll.u32 %s752_s16, 3 }
   0xf   : > { %s191_s22 = scalar_lea.vmem %s746_s0, %s568_s19  ;;  %s195_s6 = scalar_lea.vmem %s750_s4, %s556_s29 }
  0x10   : > { %v198_v1 = vld [vmem:[%s191_s22] sm:$0xff]  ;;  %v199_v2 = vld [vmem:[%s191_s22 + $0x8] sm:$0xff]  ;;  %v200_v3 = vld [vmem:[%s191_s22 + $0x10] sm:$0xff] }
  0x11   : > { %v618_v4 = vpack.c.bf16 %v199_v2, %v198_v1  ;;  %v201_v5 = vld [vmem:[%s191_s22 + $0x18] sm:$0xff]  ;;  %601 = vmatprep.mubr.msk.f32.mxu1 %vm284_vm1, %v198_v1 }
  0x12   : > { %v622_v6 = vpack.c.bf16 %v201_v5, %v200_v3 }
  0x13   : > { %619 = vmatprep.subr.bf16.mxu0 %v618_v4 }
  0x14   : > { %621 = vmatpush3.bf16.msra.mxu0 %v618_v4 }
  0x15   : > { %623 = vmatprep.subr.bf16.mxu0 %v622_v6 }
  0x18   : > { %625 = vmatpush3.bf16.msra.mxu0 %v622_v6 }
  0x19   : > { %632 = vmatprep.subr.bf16.mxu0 %v667_v29 }
  0x1b   : > { %595 = vmatmul.mubr.msk.f32.vlgmr.msra.gmra.mrb[0].mxu0 %vm202_vm0, %v197_v7 }
  0x1c   : > { %615 = vmatprep.mubr.msk.f32.mxu0 %vm668_vm3, %v669_v30 }
  0xee   : > { %v596_v8 = vpop.f32.mrb[0].mxu0 }
  0xef   : > { %v275_v9 = vpop.f32.mrb[1].mxu0  ;;  %v288_v11 = vsel %vm284_vm1, %v596_v8, -inf }
  0xf0   : > { %v285_v10 = vsel %vm284_vm1, %v275_v9, -inf }
  0xf1   : > { %286 = vmax.xlane.f32.xlu0 %v285_v10 }
  0xf5   : > { %289 = vmax.xlane.f32.xlu0 %v288_v11 }
 0x17e   : > { %v287_v12 = vpop.xlane.xlu0 %286 }
 0x17f   : > { %v291_v13 = vsub.f32 %v275_v9, %v287_v12 }
 0x181   : > { %v293_v14 = vmul.f32 1.442695, %v291_v13 }
 0x182   : > { %v290_v15 = vpop.xlane.xlu0 %289 }
 0x183   : > { %649 = vpow2.f32 %v293_v14  ;;  %v292_v16 = vsub.f32 %v596_v8, %v290_v15 }
 0x185   : > { %v295_v17 = vmul.f32 1.442695, %v292_v16 }
 0x187   : > { %651 = vpow2.f32 %v295_v17 }
 0x18d   : > { %v650_v18 = vpop.eup %649 }
 0x18e   : > { %v297_v19 = vsel %vm284_vm1, %v650_v18, 0.0 }
 0x18f   : > { %298 = vadd.xlane.f32.xlu1 %v297_v19 }
 0x191   : > { %v652_v20 = vpop.eup %651 }
 0x192   : > { %v300_v21 = vsel %vm284_vm1, %v652_v20, 0.0 }
 0x193   : > { %301 = vadd.xlane.f32.xlu1 %v300_v21 }
 0x21c   : > { %v299_v22 = vpop.xlane.xlu1 %298 }
 0x21d   : > { %653 = vrcp.f32 %v299_v22 }
 0x220   : > { %v302_v23 = vpop.xlane.xlu1 %301 }
 0x221   : > { %655 = vrcp.f32 %v302_v23 }
 0x227   : > { %v654_v24 = vpop.eup %653 }
 0x228   : > { %v304_v26 = vmul.f32 %v654_v24, %v650_v18 }
 0x22b   : > { %v656_v25 = vpop.eup %655 }
 0x22c   : > { %v306_v27 = vmul.f32 %v656_v25, %v652_v20 }
 0x22e   : > { %v626_v28 = vpack.c.bf16 %v306_v27, %v304_v26 }
 0x230   : > { %628 = vmatprep.subr.msk.bf16.mxu1 %vm627_vm2, %v626_v28 }
 0x231   : > { %631 = vmatpush3.bf16.xpose.msk.msra.mxu1 %vm627_vm2, %v626_v28 }
 0x238   : > { %602 = vmatmul.mubr.msk.f32.vlgmr.msra.gmra.mrb[0].mxu1 %vm284_vm1, %v199_v2 }
 0x239   : > { %604 = vmatprep.mubr.msk.f32.mxu1 %vm284_vm1, %v200_v3 }
 0x23c   : > { %605 = vmatmul.mubr.msk.f32.gmra.mrb[2].mxu1 %vm284_vm1, %v201_v5 }
 0x30b   : > { %v603_v31 = vpop.f32.mrb[0].mxu1 }
 0x30c   : > { %412 = vst.msk [vmem:[#allocation2 + $0x8] sm:$0xff] %vm410_vm4, %v603_v31  ;;  %v391_v32 = vpop.f32.mrb[1].mxu1 }
 0x30d   : > { %411 = vst.msk [vmem:[#allocation2] sm:$0xff] %vm410_vm4, %v391_v32 }
 0x30f   : > { %v606_v33 = vpop.f32.mrb[2].mxu1 }
 0x310   : > { %414 = vst.msk [vmem:[#allocation2 + $0x18] sm:$0xff] %vm410_vm4, %v606_v33  ;;  %v401_v34 = vpop.f32.mrb[3].mxu1 }
 0x311   : > { %413 = vst.msk [vmem:[#allocation2 + $0x10] sm:$0xff] %vm410_vm4, %v401_v34 }
 0x313   : > { %v417_v35 = vld [vmem:[#allocation2 + $0x8] sm:$0xff] }
 0x314   : > { %v416_v36 = vld [vmem:[#allocation2] sm:$0xff] }
 0x315   : > { %v633_v37 = vpack.c.bf16 %v417_v35, %v416_v36 }
 0x317   : > { %634 = vmatpush3.bf16.msra.mxu0 %v633_v37  ;;  %v419_v38 = vld [vmem:[#allocation2 + $0x18] sm:$0xff] }
 0x318   : > { %635 = vmatprep.subr.bf16.mxu0 %v667_v29  ;;  %v418_v39 = vld [vmem:[#allocation2 + $0x10] sm:$0xff] }
 0x319   : > { %v636_v40 = vpack.c.bf16 %v419_v38, %v418_v39 }
 0x31b   : > { %637 = vmatpush3.bf16.msra.mxu0 %v636_v40 }
 0x31e   : > { %616 = vmatmul.mubr.msk.f32.vlgmr.msra.gmra.mrb[2].mxu0 %vm202_vm0, %v415_v41 }
 0x3f1   : > { %v490_v43 = vpop.f32.mrb[2].mxu0 }
 0x3f2   : > { %v491_v44 = vadd.f32 %v490_v43, %v420_v42  ;;  %v617_v45 = vpop.f32.mrb[3].mxu0 }
 0x3f4   : > { %657 = vtanh.f32 %v491_v44 }
 0x3fe   : > { %v658_v46 = vpop.eup %657 }
 0x3ff   : > { %495 = vst.msk [vmem:[%s195_s6] sm:$0xff] %vm410_vm4, %v658_v46 }
 0x400 PF: > { %s14_s15 = sadd.s32 1, %s665_s15  }
 0x401   : > { %p11_p4 = scmp.ge.s32.totalorder %s14_s15, 4  }
 0x403   :  { %13 = sbr.rel (!%p11_p4) target bundleno = 1 (0x1), region = 66 }

</bundles_post_ra>
